<compile_context>
chip_gen: v7x
topology: tpu7x:2x2x1
jax: 0.10.0
libtpu: 0.0.40
codegen_flags: <defaults>
</compile_context>

<pallas_src>
import jax
import jax.numpy as jnp
from jax.experimental import pallas as pl
from jax.experimental.pallas import tpu as pltpu

HIDDEN = 32
GATE_SLAB = 4 * 128   # each of the 4 gates padded to its own 128-lane block
STATE_W = 128         # padded lane width for h / c / head slabs


def _cdiv(a, b):
    return -(-a // b)


# ----------------------------------------------------------------------------
# Kernel: one LSTM step per grid iteration; h/c carried in VMEM scratch.
# ----------------------------------------------------------------------------
def _ac_rollout_kernel(x_ref, wx_ref, wh_ref, b_ref, whead_ref, bhead_ref,
                       h0_ref, c0_ref, out_ref, h_scr, c_scr):
    @pl.when(pl.program_id(0) == 0)
    def _():
        h_scr[...] = h0_ref[...]
        c_scr[...] = c0_ref[...]

    h = h_scr[...]                         # [BPAD, 128], real lanes 0:32
    c = c_scr[...]                         # [BPAD, 128], real lanes 0:32

    # Gate pre-activations: [BPAD, 512]; each gate in its own 128-lane block.
    gates = (jnp.dot(x_ref[...], wx_ref[...], preferred_element_type=jnp.float32)
             + jnp.dot(h, wh_ref[...], preferred_element_type=jnp.float32)
             + b_ref[...])

    # Tile-aligned 128-lane slices (no sub-vreg relayouts).
    i_g = jax.nn.sigmoid(gates[:, 0:128])
    f_g = jax.nn.sigmoid(gates[:, 128:256])
    g_g = jnp.tanh(gates[:, 256:384])
    o_g = jax.nn.sigmoid(gates[:, 384:512])

    # Padding lanes stay exactly 0: sigmoid(0)*0 + sigmoid(0)*tanh(0) = 0.
    c_new = f_g * c + i_g * g_g
    h_new = o_g * jnp.tanh(c_new)

    h_scr[...] = h_new
    c_scr[...] = c_new

    # Fused critic(1)+actor(3) head, pre-placed in lanes 64:68 of a 128 slab.
    head = (jnp.dot(h_new, whead_ref[...], preferred_element_type=jnp.float32)
            + bhead_ref[...])

    bp = h_scr.shape[0]
    out_ref[0:bp, :] = h_new + head        # lanes 0:32 = h, 64:68 = head
    out_ref[bp:2 * bp, :] = c_new          # lanes 0:32 = c


# ----------------------------------------------------------------------------
# One-time parameter packing (hoisted out of the per-call path).
# ----------------------------------------------------------------------------
def prepare_params(params):
    w_ih_t = params["w_ih_t"].astype(jnp.float32)   # [input_dim, 4H]
    w_hh_t = params["w_hh_t"].astype(jnp.float32)   # [H, 4H]
    input_dim = w_ih_t.shape[0]
    kx = 128 * _cdiv(input_dim, 128)                # pad K to a 128 multiple
    H = HIDDEN

    wx = jnp.zeros((kx, GATE_SLAB), jnp.float32)
    wh = jnp.zeros((STATE_W, GATE_SLAB), jnp.float32)
    b = jnp.zeros((1, GATE_SLAB), jnp.float32)
    b_lstm = (params["b_ih"] + params["b_hh"]).astype(jnp.float32)
    for g in range(4):
        wx = wx.at[:input_dim, g * 128:g * 128 + H].set(w_ih_t[:, g * H:(g + 1) * H])
        wh = wh.at[:H, g * 128:g * 128 + H].set(w_hh_t[:, g * H:(g + 1) * H])
        b = b.at[0, g * 128:g * 128 + H].set(b_lstm[g * H:(g + 1) * H])

    whead = jnp.zeros((STATE_W, STATE_W), jnp.float32)
    whead = whead.at[:H, 64:65].set(params["w_critic_t"].astype(jnp.float32))
    whead = whead.at[:H, 65:68].set(params["w_actor_t"].astype(jnp.float32))
    bhead = jnp.zeros((1, STATE_W), jnp.float32)
    bhead = bhead.at[0, 64:65].set(params["b_critic"].astype(jnp.float32))
    bhead = bhead.at[0, 65:68].set(params["b_actor"].astype(jnp.float32))

    return {"wx": wx, "wh": wh, "b": b, "whead": whead, "bhead": bhead,
            "input_dim": input_dim, "kx": kx}


# ----------------------------------------------------------------------------
# Wrappers.
# ----------------------------------------------------------------------------
def actor_critic_rollout(xs, hx, cx, packed):
    """Fused T-step rollout. xs: [T, ..., input_dim]; hx, cx: [B, 32]."""
    input_dim, kx = packed["input_dim"], packed["kx"]
    T = xs.shape[0]
    xs2 = xs.reshape(T, -1, input_dim).astype(jnp.float32)
    B = xs2.shape[1]
    BPAD = max(8, 8 * _cdiv(B, 8))

    xs_p = jnp.pad(xs2, ((0, 0), (0, BPAD - B), (0, kx - input_dim)))
    h0 = jnp.pad(hx.astype(jnp.float32), ((0, BPAD - B), (0, STATE_W - HIDDEN)))
    c0 = jnp.pad(cx.astype(jnp.float32), ((0, BPAD - B), (0, STATE_W - HIDDEN)))

    resident = lambda shape: pl.BlockSpec(shape, lambda t: (0,) * len(shape))

    slab = pl.pallas_call(
        _ac_rollout_kernel,
        out_shape=jax.ShapeDtypeStruct((T, 2 * BPAD, STATE_W), jnp.float32),
        grid_spec=pltpu.PrefetchScalarGridSpec(
            num_scalar_prefetch=0,
            grid=(T,),
            in_specs=[
                pl.BlockSpec((None, BPAD, kx), lambda t: (t, 0, 0)),  # x_t
                resident((kx, GATE_SLAB)),          # W_x   (VMEM-resident)
                resident((STATE_W, GATE_SLAB)),     # W_h
                resident((1, GATE_SLAB)),           # fused LSTM bias
                resident((STATE_W, STATE_W)),       # fused head weight
                resident((1, STATE_W)),             # fused head bias
                resident((BPAD, STATE_W)),          # h0
                resident((BPAD, STATE_W)),          # c0
            ],
            out_specs=pl.BlockSpec((None, 2 * BPAD, STATE_W),
                                   lambda t: (t, 0, 0)),
            scratch_shapes=[pltpu.VMEM((BPAD, STATE_W), jnp.float32),
                            pltpu.VMEM((BPAD, STATE_W), jnp.float32)],
        ),
        compiler_params=pltpu.CompilerParams(
            dimension_semantics=("arbitrary",)),
    )(xs_p, packed["wx"], packed["wh"], packed["b"],
      packed["whead"], packed["bhead"], h0, c0)

    return {
        "state": slab[:, :B, 64:65],               # [T, B, 1]
        "actions": slab[:, :B, 65:68],             # [T, B, 3]
        "hidden": slab[:, :B, 0:HIDDEN],           # [T, B, 32]
        "cell": slab[:, BPAD:BPAD + B, 0:HIDDEN],  # [T, B, 32]
    }


def actor_critic_forward(x, hx, cx, packed):
    """Pallas-backed equivalent of ActorCritic.forward (single step, T=1)."""
    x2 = x.reshape(-1, packed["input_dim"])        # x.view(-1, input_dim)
    out = actor_critic_rollout(x2[None], hx, cx, packed)
    return {"state": out["state"][0], "actions": out["actions"][0],
            "hidden": out["hidden"][0], "cell": out["cell"][0]}


# ----------------------------------------------------------------------------
# Parameter init mirroring the PyTorch module, and a pure-JAX reference.
# ----------------------------------------------------------------------------
def init_params(key, internal_states=False):
    input_dim = 100 if internal_states else 128
    ks = jax.random.split(key, 8)
    H = HIDDEN
    lstm_bound = 1.0 / jnp.sqrt(jnp.float32(H))    # PyTorch LSTMCell default

    def xavier_normal(k, fan_out, fan_in):
        std = jnp.sqrt(2.0 / (fan_in + fan_out))
        return std * jax.random.normal(k, (fan_out, fan_in), jnp.float32)

    w_ih = jax.random.uniform(ks[0], (4 * H, input_dim), jnp.float32,
                              -lstm_bound, lstm_bound)
    w_hh = jax.random.uniform(ks[1], (4 * H, H), jnp.float32,
                              -lstm_bound, lstm_bound)
    b_ih = jax.random.uniform(ks[2], (4 * H,), jnp.float32, -lstm_bound, lstm_bound)
    b_hh = jax.random.uniform(ks[3], (4 * H,), jnp.float32, -lstm_bound, lstm_bound)

    w_critic = xavier_normal(ks[4], 1, H)          # init_weights: xavier_normal_
    b_critic = jnp.zeros((1,), jnp.float32)
    w_actor = xavier_normal(ks[5], 3, H)
    b_actor = jnp.zeros((3,), jnp.float32)

    return {
        "w_ih_t": w_ih.T, "w_hh_t": w_hh.T, "b_ih": b_ih, "b_hh": b_hh,
        "w_critic_t": w_critic.T, "b_critic": b_critic,
        "w_actor_t": w_actor.T, "b_actor": b_actor,
    }


def _reference_forward(x, hx, cx, params):
    input_dim = params["w_ih_t"].shape[0]
    x2 = x.reshape(-1, input_dim)
    gates = (x2 @ params["w_ih_t"] + params["b_ih"]
             + hx @ params["w_hh_t"] + params["b_hh"])
    H = HIDDEN
    i = jax.nn.sigmoid(gates[:, 0 * H:1 * H])
    f = jax.nn.sigmoid(gates[:, 1 * H:2 * H])
    g = jnp.tanh(gates[:, 2 * H:3 * H])
    o = jax.nn.sigmoid(gates[:, 3 * H:4 * H])
    c_new = f * cx + i * g
    h_new = o * jnp.tanh(c_new)
    state = h_new @ params["w_critic_t"] + params["b_critic"]
    actions = h_new @ params["w_actor_t"] + params["b_actor"]
    return {"state": state, "actions": actions, "hidden": h_new, "cell": c_new}


if __name__ == "__main__":
    key = jax.random.PRNGKey(0)
    k_param, k_x, k_h, k_c, k_seq, k_param2, k_x2 = jax.random.split(key, 7)

    B, T = 2, 8
    TOL = dict(atol=1e-4, rtol=1e-4)

    # --- single-step forward (input_dim = 128 path) -------------------------
    params = init_params(k_param, internal_states=False)
    packed = prepare_params(params)
    input_dim = packed["input_dim"]

    x = jax.random.normal(k_x, (B, input_dim), jnp.float32)
    hx = jax.random.normal(k_h, (B, HIDDEN), jnp.float32)
    cx = jax.random.normal(k_c, (B, HIDDEN), jnp.float32)

    out = actor_critic_forward(x, hx, cx, packed)
    jax.block_until_ready(out)
    ref = _reference_forward(x, hx, cx, params)
    for name in ("state", "actions", "hidden", "cell"):
        assert out[name].shape == ref[name].shape, name
        assert jnp.allclose(out[name], ref[name], **TOL), name
    assert out["state"].shape == (B, 1)
    assert out["actions"].shape == (B, 3)

    # --- fused T-step rollout (one pallas_call for all steps) ---------------
    xs = jax.random.normal(k_seq, (T, B, input_dim), jnp.float32)
    roll = actor_critic_rollout(xs, hx, cx, packed)
    jax.block_until_ready(roll)
    h_r, c_r = hx, cx
    for t in range(T):
        r = _reference_forward(xs[t], h_r, c_r, params)
        assert jnp.allclose(roll["state"][t], r["state"], **TOL), ("state", t)
        assert jnp.allclose(roll["actions"][t], r["actions"], **TOL), ("actions", t)
        assert jnp.allclose(roll["hidden"][t], r["hidden"], **TOL), ("hidden", t)
        assert jnp.allclose(roll["cell"][t], r["cell"], **TOL), ("cell", t)
        h_r, c_r = r["hidden"], r["cell"]

    # --- internal_states=True path (input_dim = 100, padded to 128) ---------
    params100 = init_params(k_param2, internal_states=True)
    packed100 = prepare_params(params100)
    x100 = jax.random.normal(k_x2, (B, 100), jnp.float32)
    out100 = actor_critic_forward(x100, hx, cx, packed100)
    jax.block_until_ready(out100)
    ref100 = _reference_forward(x100, hx, cx, params100)
    for name in ("state", "actions", "hidden", "cell"):
        assert jnp.allclose(out100[name], ref100[name], **TOL), ("id100", name)

    print("KERNEL_OK")
</pallas_src>

<mosaic_0001>
module attributes {stable_mosaic.version = 11 : i64} {
  func.func @_ac_rollout_kernel(%arg0: i32, %arg1: memref<1x8x128xf32, #tpu.memory_space<vmem>>, %arg2: memref<128x512xf32, #tpu.memory_space<vmem>>, %arg3: memref<128x512xf32, #tpu.memory_space<vmem>>, %arg4: memref<1x512xf32, #tpu.memory_space<vmem>>, %arg5: memref<128x128xf32, #tpu.memory_space<vmem>>, %arg6: memref<1x128xf32, #tpu.memory_space<vmem>>, %arg7: memref<8x128xf32, #tpu.memory_space<vmem>>, %arg8: memref<8x128xf32, #tpu.memory_space<vmem>>, %arg9: memref<1x16x128xf32, #tpu.memory_space<vmem>>, %arg10: memref<8x128xf32, #tpu.memory_space<vmem>>, %arg11: memref<8x128xf32, #tpu.memory_space<vmem>>) attributes {dimension_semantics = [#tpu.dimension_semantics<arbitrary>], iteration_bounds = array<i64: 1>, scalar_prefetch = 0 : i64, scratch_operands = 2 : i64, tpu.core_type = #tpu.core_type<tc>, window_params = [{transform_indices = @transform_0, window_bounds = array<i64: 1, 8, 128>}, {pipeline_mode = #tpu.pipeline_mode<synchronous>, transform_indices = @transform_1, window_bounds = array<i64: 128, 512>}, {pipeline_mode = #tpu.pipeline_mode<synchronous>, transform_indices = @transform_2, window_bounds = array<i64: 128, 512>}, {pipeline_mode = #tpu.pipeline_mode<synchronous>, transform_indices = @transform_3, window_bounds = array<i64: 1, 512>}, {pipeline_mode = #tpu.pipeline_mode<synchronous>, transform_indices = @transform_4, window_bounds = array<i64: 128, 128>}, {pipeline_mode = #tpu.pipeline_mode<synchronous>, transform_indices = @transform_5, window_bounds = array<i64: 1, 128>}, {pipeline_mode = #tpu.pipeline_mode<synchronous>, transform_indices = @transform_6, window_bounds = array<i64: 8, 128>}, {pipeline_mode = #tpu.pipeline_mode<synchronous>, transform_indices = @transform_7, window_bounds = array<i64: 8, 128>}, {transform_indices = @transform_8, window_bounds = array<i64: 1, 16, 128>}]} {
    %c0_i32 = arith.constant 0 : i32
    %0 = arith.cmpi eq, %arg0, %c0_i32 : i32
    %1 = arith.extui %0 : i1 to i32
    %c0_i32_0 = arith.constant 0 : i32
    %2 = arith.cmpi ne, %1, %c0_i32_0 : i32
    scf.if %2 {
      %c0_31 = arith.constant 0 : index
      %c0_32 = arith.constant 0 : index
      %54 = vector.load %arg7[%c0_31, %c0_32] : memref<8x128xf32, #tpu.memory_space<vmem>>, vector<8x128xf32>
      %c0_33 = arith.constant 0 : index
      %c0_34 = arith.constant 0 : index
      %55 = vector.load %arg10[%c0_33, %c0_34] : memref<8x128xf32, #tpu.memory_space<vmem>>, vector<8x128xf32>
      tpu.vector_store %arg10[%c0_33, %c0_34], %54 {strides = array<i32>} : memref<8x128xf32, #tpu.memory_space<vmem>>, vector<8x128xf32>,
      %c0_35 = arith.constant 0 : index
      %c0_36 = arith.constant 0 : index
      %56 = vector.load %arg8[%c0_35, %c0_36] : memref<8x128xf32, #tpu.memory_space<vmem>>, vector<8x128xf32>
      %c0_37 = arith.constant 0 : index
      %c0_38 = arith.constant 0 : index
      %57 = vector.load %arg11[%c0_37, %c0_38] : memref<8x128xf32, #tpu.memory_space<vmem>>, vector<8x128xf32>
      tpu.vector_store %arg11[%c0_37, %c0_38], %56 {strides = array<i32>} : memref<8x128xf32, #tpu.memory_space<vmem>>, vector<8x128xf32>,
    } else {
    }
    %c0 = arith.constant 0 : index
    %c0_1 = arith.constant 0 : index
    %3 = vector.load %arg10[%c0, %c0_1] : memref<8x128xf32, #tpu.memory_space<vmem>>, vector<8x128xf32>
    %c0_2 = arith.constant 0 : index
    %c0_3 = arith.constant 0 : index
    %4 = vector.load %arg11[%c0_2, %c0_3] : memref<8x128xf32, #tpu.memory_space<vmem>>, vector<8x128xf32>
    %c0_4 = arith.constant 0 : index
    %c0_5 = arith.constant 0 : index
    %c0_6 = arith.constant 0 : index
    %5 = vector.load %arg1[%c0_4, %c0_5, %c0_6] : memref<1x8x128xf32, #tpu.memory_space<vmem>>, vector<1x8x128xf32>
    %6 = vector.shape_cast %5 : vector<1x8x128xf32> to vector<8x128xf32>
    %c0_7 = arith.constant 0 : index
    %c0_8 = arith.constant 0 : index
    %7 = vector.load %arg2[%c0_7, %c0_8] : memref<128x512xf32, #tpu.memory_space<vmem>>, vector<128x512xf32>
    %cst = arith.constant dense<0.000000e+00> : vector<8x512xf32>
    %8 = tpu.matmul %6, %7, %cst {dimension_numbers = #tpu.dot_dimension_numbers<[1], [0], [0], [1], [0, 0, 1, 1], [], []>} : vector<8x128xf32>, vector<128x512xf32>, vector<8x512xf32> -> vector<8x512xf32>
    %c0_9 = arith.constant 0 : index
    %c0_10 = arith.constant 0 : index
    %9 = vector.load %arg3[%c0_9, %c0_10] : memref<128x512xf32, #tpu.memory_space<vmem>>, vector<128x512xf32>
    %cst_11 = arith.constant dense<0.000000e+00> : vector<8x512xf32>
    %10 = tpu.matmul %3, %9, %cst_11 {dimension_numbers = #tpu.dot_dimension_numbers<[1], [0], [0], [1], [0, 0, 1, 1], [], []>} : vector<8x128xf32>, vector<128x512xf32>, vector<8x512xf32> -> vector<8x512xf32>
    %11 = arith.addf %8, %10 : vector<8x512xf32>
    %c0_12 = arith.constant 0 : index
    %c0_13 = arith.constant 0 : index
    %12 = vector.load %arg4[%c0_12, %c0_13] : memref<1x512xf32, #tpu.memory_space<vmem>>, vector<1x512xf32>
    %13 = vector.broadcast %12 : vector<1x512xf32> to vector<8x512xf32>
    %14 = arith.addf %11, %13 : vector<8x512xf32>
    %15 = vector.extract_strided_slice %14 {offsets = [0, 0], sizes = [8, 128], strides = [1, 1]} : vector<8x512xf32> to vector<8x128xf32>
    %16 = arith.negf %15 : vector<8x128xf32>
    %17 = math.exp %16 : vector<8x128xf32>
    %cst_14 = arith.constant 1.000000e+00 : f32
    %18 = vector.broadcast %cst_14 : f32 to vector<8x128xf32>
    %19 = arith.addf %18, %17 : vector<8x128xf32>
    %20 = arith.divf %18, %19 : vector<8x128xf32>
    %21 = vector.extract_strided_slice %14 {offsets = [0, 128], sizes = [8, 128], strides = [1, 1]} : vector<8x512xf32> to vector<8x128xf32>
    %22 = arith.negf %21 : vector<8x128xf32>
    %23 = math.exp %22 : vector<8x128xf32>
    %cst_15 = arith.constant 1.000000e+00 : f32
    %24 = vector.broadcast %cst_15 : f32 to vector<8x128xf32>
    %25 = arith.addf %24, %23 : vector<8x128xf32>
    %26 = arith.divf %24, %25 : vector<8x128xf32>
    %27 = vector.extract_strided_slice %14 {offsets = [0, 256], sizes = [8, 128], strides = [1, 1]} : vector<8x512xf32> to vector<8x128xf32>
    %28 = math.tanh %27 : vector<8x128xf32>
    %29 = vector.extract_strided_slice %14 {offsets = [0, 384], sizes = [8, 128], strides = [1, 1]} : vector<8x512xf32> to vector<8x128xf32>
    %30 = arith.negf %29 : vector<8x128xf32>
    %31 = math.exp %30 : vector<8x128xf32>
    %cst_16 = arith.constant 1.000000e+00 : f32
    %32 = vector.broadcast %cst_16 : f32 to vector<8x128xf32>
    %33 = arith.addf %32, %31 : vector<8x128xf32>
    %34 = arith.divf %32, %33 : vector<8x128xf32>
    %35 = arith.mulf %26, %4 : vector<8x128xf32>
    %36 = arith.mulf %20, %28 : vector<8x128xf32>
    %37 = arith.addf %35, %36 : vector<8x128xf32>
    %38 = math.tanh %37 : vector<8x128xf32>
    %39 = arith.mulf %34, %38 : vector<8x128xf32>
    %c0_17 = arith.constant 0 : index
    %c0_18 = arith.constant 0 : index
    %40 = vector.load %arg10[%c0_17, %c0_18] : memref<8x128xf32, #tpu.memory_space<vmem>>, vector<8x128xf32>
    tpu.vector_store %arg10[%c0_17, %c0_18], %39 {strides = array<i32>} : memref<8x128xf32, #tpu.memory_space<vmem>>, vector<8x128xf32>,
    %c0_19 = arith.constant 0 : index
    %c0_20 = arith.constant 0 : index
    %41 = vector.load %arg11[%c0_19, %c0_20] : memref<8x128xf32, #tpu.memory_space<vmem>>, vector<8x128xf32>
    tpu.vector_store %arg11[%c0_19, %c0_20], %37 {strides = array<i32>} : memref<8x128xf32, #tpu.memory_space<vmem>>, vector<8x128xf32>,
    %c0_21 = arith.constant 0 : index
    %c0_22 = arith.constant 0 : index
    %42 = vector.load %arg5[%c0_21, %c0_22] : memref<128x128xf32, #tpu.memory_space<vmem>>, vector<128x128xf32>
    %cst_23 = arith.constant dense<0.000000e+00> : vector<8x128xf32>
    %43 = tpu.matmul %39, %42, %cst_23 {dimension_numbers = #tpu.dot_dimension_numbers<[1], [0], [0], [1], [0, 0, 1, 1], [], []>} : vector<8x128xf32>, vector<128x128xf32>, vector<8x128xf32> -> vector<8x128xf32>
    %c0_24 = arith.constant 0 : index
    %c0_25 = arith.constant 0 : index
    %44 = vector.load %arg6[%c0_24, %c0_25] : memref<1x128xf32, #tpu.memory_space<vmem>>, vector<1x128xf32>
    %45 = vector.broadcast %44 : vector<1x128xf32> to vector<8x128xf32>
    %46 = arith.addf %43, %45 : vector<8x128xf32>
    %47 = arith.addf %39, %46 : vector<8x128xf32>
    %c0_26 = arith.constant 0 : index
    %c0_27 = arith.constant 0 : index
    %c0_28 = arith.constant 0 : index
    %48 = vector.load %arg9[%c0_26, %c0_27, %c0_28] : memref<1x16x128xf32, #tpu.memory_space<vmem>>, vector<1x8x128xf32>
    %49 = vector.shape_cast %48 : vector<1x8x128xf32> to vector<8x128xf32>
    %50 = vector.shape_cast %47 : vector<8x128xf32> to vector<1x8x128xf32>
    tpu.vector_store %arg9[%c0_26, %c0_27, %c0_28], %50 {strides = array<i32>} : memref<1x16x128xf32, #tpu.memory_space<vmem>>, vector<1x8x128xf32>,
    %c0_29 = arith.constant 0 : index
    %c8 = arith.constant 8 : index
    %c0_30 = arith.constant 0 : index
    %51 = vector.load %arg9[%c0_29, %c8, %c0_30] : memref<1x16x128xf32, #tpu.memory_space<vmem>>, vector<1x8x128xf32>
    %52 = vector.shape_cast %51 : vector<1x8x128xf32> to vector<8x128xf32>
    %53 = vector.shape_cast %37 : vector<8x128xf32> to vector<1x8x128xf32>
    tpu.vector_store %arg9[%c0_29, %c8, %c0_30], %53 {strides = array<i32>} : memref<1x16x128xf32, #tpu.memory_space<vmem>>, vector<1x8x128xf32>,
    return
  }
  func.func @transform_0(%arg0: i32) -> (i32, i32, i32) {
    %c0_i32 = arith.constant 0 : i32
    %c0_i32_0 = arith.constant 0 : i32
    %c0_i32_1 = arith.constant 0 : i32
    return %arg0, %c0_i32, %c0_i32_0 : i32, i32, i32
  }
  func.func @transform_1(%arg0: i32) -> (i32, i32) {
    %c0_i32 = arith.constant 0 : i32
    %c0_i32_0 = arith.constant 0 : i32
    %c0_i32_1 = arith.constant 0 : i32
    return %c0_i32, %c0_i32_0 : i32, i32
  }
  func.func @transform_2(%arg0: i32) -> (i32, i32) {
    %c0_i32 = arith.constant 0 : i32
    %c0_i32_0 = arith.constant 0 : i32
    %c0_i32_1 = arith.constant 0 : i32
    return %c0_i32, %c0_i32_0 : i32, i32
  }
  func.func @transform_3(%arg0: i32) -> (i32, i32) {
    %c0_i32 = arith.constant 0 : i32
    %c0_i32_0 = arith.constant 0 : i32
    %c0_i32_1 = arith.constant 0 : i32
    return %c0_i32, %c0_i32_0 : i32, i32
  }
  func.func @transform_4(%arg0: i32) -> (i32, i32) {
    %c0_i32 = arith.constant 0 : i32
    %c0_i32_0 = arith.constant 0 : i32
    %c0_i32_1 = arith.constant 0 : i32
    return %c0_i32, %c0_i32_0 : i32, i32
  }
  func.func @transform_5(%arg0: i32) -> (i32, i32) {
    %c0_i32 = arith.constant 0 : i32
    %c0_i32_0 = arith.constant 0 : i32
    %c0_i32_1 = arith.constant 0 : i32
    return %c0_i32, %c0_i32_0 : i32, i32
  }
  func.func @transform_6(%arg0: i32) -> (i32, i32) {
    %c0_i32 = arith.constant 0 : i32
    %c0_i32_0 = arith.constant 0 : i32
    %c0_i32_1 = arith.constant 0 : i32
    return %c0_i32, %c0_i32_0 : i32, i32
  }
  func.func @transform_7(%arg0: i32) -> (i32, i32) {
    %c0_i32 = arith.constant 0 : i32
    %c0_i32_0 = arith.constant 0 : i32
    %c0_i32_1 = arith.constant 0 : i32
    return %c0_i32, %c0_i32_0 : i32, i32
  }
  func.func @transform_8(%arg0: i32) -> (i32, i32, i32) {
    %c0_i32 = arith.constant 0 : i32
    %c0_i32_0 = arith.constant 0 : i32
    %c0_i32_1 = arith.constant 0 : i32
    return %arg0, %c0_i32, %c0_i32_0 : i32, i32, i32
  }
}

</mosaic_0001>

<bundles_post_ra>
// kernel: tpu_custom_call.1
= control target key start
LH: loop header
LB: loop body
LE: loop exit
PB: predicated region body
PF: predicated region fallthrough
CT: control target
= control target key end

     0   :  { %13 = vsyncpa [#allocation5], 0  ;;  %s1221_s0 = inlined_call_operand.hbm [shape: f32[1,8,128], index: 0, kind: input, shape index: {}]   ;;  %s1222_s1 = inlined_call_operand.hbm [shape: f32[128,512], index: 1, kind: input, shape index: {}]   ;;  %s1223_s2 = inlined_call_operand.hbm [shape: f32[128,512], index: 2, kind: input, shape index: {}]   ;;  %s1224_s3 = inlined_call_operand.hbm [shape: f32[1,512], index: 3, kind: input, shape index: {}]   ;;  %s1225_s4 = inlined_call_operand.hbm [shape: f32[128,128], index: 4, kind: input, shape index: {}]   ;;  %s1226_s5 = inlined_call_operand.vmem [shape: f32[1,128], index: 5, kind: input, shape index: {}]   ;;  %s1227_s6 = inlined_call_operand.vmem [shape: f32[8,128], index: 6, kind: input, shape index: {}]   ;;  %s1228_s7 = inlined_call_operand.vmem [shape: f32[8,128], index: 7, kind: input, shape index: {}]   ;;  %s1229_s8 = inlined_call_operand.hbm [shape: f32[1,16,128], index: 8, kind: output, shape index: {}]  }
   0x1   :  { %14 = vsyncpa [#allocation8], 0 }
   0x2   :  { %15 = vsyncpa [#allocation11], 0 }
   0x3   :  { %16 = vsyncpa [#allocation6], 0  ;;  %s1065_s27 = smov [#allocation7]   ;;  %s925_s9 = scalar_lea.hbm %s1222_s1, 8192 }
   0x4   :  { %s32_s28 = sshll.u32 %s1065_s27, 4  ;;  %p926_p0 = scmp.ne.s32.totalorder %s1222_s1, %s925_s9  ;;  %s33_s28 = int_to_ptr.vmem [resolvable:$true] %s32_s28 }
   0x5   :  { %p929_p1 = scmp.lt.u32.totalorder %s925_s9, %s1222_s1 }
   0x7   :  { %p931_p2 = pnand %p929_p1, %p926_p0 }
   0x9   :  { %934 = shalt.err (!%p931_p2)
}
   0xa   :  { %s935_s14 = scalar_lea.vmem %s33_s28, 8192  ;;  %p940_p4 = scmp.lt.s32.totalorder %s33_s28, %s33_s28 }
   0xb   :  { %p936_p3 = scmp.ne.s32.totalorder %s33_s28, %s935_s14  ;;  %p941_p5 = scmp.lt.s32.totalorder %s935_s14, %s935_s14 }
   0xd   :  { %p942_p6 = por %p941_p5, %p940_p4 }
   0xf   :  { %p943_p7 = pnand %p942_p6, %p936_p3 }
  0x11   :  { %946 = shalt.err (!%p943_p7)
}
  0x12   :  { %s1066_s15 = smov 512   ;;  %s1067_s16 = smov 32  }
  0x13   :  { %38 = dma.hbm_to_vmem [thread:$0]  %s1222_s1, 8192, %s33_s28, [#allocation8], %s1066_s15, %s1066_s15, %s1067_s16  }
  0x14   :  { %s1068_s19 = smov [#allocation10]   ;;  %s1069_s21 = smov [#allocation4]  }
  0x15   :  { %s57_s20 = sshll.u32 %s1068_s19, 4  ;;  %s23_s22 = sshll.u32 %s1069_s21, 4  ;;  %s58_s20 = int_to_ptr.vmem [resolvable:$true] %s57_s20  ;;  %s24_s22 = int_to_ptr.vmem [resolvable:$true] %s23_s22 }
  0x16   :  { %s947_s25 = scalar_lea.hbm %s1224_s3, 64 }
  0x17   :  { %p948_p8 = scmp.ne.s32.totalorder %s1224_s3, %s947_s25  ;;  %p951_p9 = scmp.lt.u32.totalorder %s947_s25, %s1224_s3 }
  0x19   :  { %p953_p10 = pnand %p951_p9, %p948_p8 }
  0x1b   :  { %956 = shalt.err (!%p953_p10)
}
  0x1c   :  { %s957_s1 = scalar_lea.vmem %s58_s20, 64  ;;  %p962_p12 = scmp.lt.s32.totalorder %s58_s20, %s58_s20 }
  0x1d   :  { %p958_p11 = scmp.ne.s32.totalorder %s58_s20, %s957_s1  ;;  %p963_p13 = scmp.lt.s32.totalorder %s957_s1, %s957_s1 }
  0x1f   :  { %p964_p0 = por %p963_p13, %p962_p12 }
  0x21   :  { %p965_p1 = pnand %p964_p0, %p958_p11 }
  0x23   :  { %968 = shalt.err (!%p965_p1)
}
  0x24   :  { %60 = dma.hbm_to_vmem [thread:$0]  %s1224_s3, 64, %s58_s20, [#allocation11]  }
  0x25   :  { %s969_s12 = scalar_lea.hbm %s1221_s0, 128 }
  0x26   :  { %p970_p2 = scmp.ne.s32.totalorder %s1221_s0, %s969_s12  ;;  %p973_p3 = scmp.lt.u32.totalorder %s969_s12, %s1221_s0 }
  0x28   :  { %p975_p4 = pnand %p973_p3, %p970_p2 }
  0x2a   :  { %978 = shalt.err (!%p975_p4)
}
  0x2b   :  { %s979_s19 = scalar_lea.vmem %s24_s22, 128  ;;  %p984_p6 = scmp.lt.s32.totalorder %s24_s22, %s24_s22 }
  0x2c   :  { %p980_p5 = scmp.ne.s32.totalorder %s24_s22, %s979_s19  ;;  %p985_p7 = scmp.lt.s32.totalorder %s979_s19, %s979_s19 }
  0x2e   :  { %p986_p8 = por %p985_p7, %p984_p6 }
  0x30   :  { %p987_p9 = pnand %p986_p8, %p980_p5 }
  0x32   :  { %990 = shalt.err (!%p987_p9)
}
  0x33   :  { %26 = dma.hbm_to_vmem [thread:$0]  %s1221_s0, 128, %s24_s22, [#allocation5]  }
  0x34   :  { %s1070_s21 = smov [#allocation9]   ;;  %s1071_s24 = smov [#allocation12]  }
  0x35   :  { %s44_s23 = sshll.u32 %s1070_s21, 4  ;;  %s66_s25 = sshll.u32 %s1071_s24, 4  ;;  %s45_s23 = int_to_ptr.vmem [resolvable:$true] %s44_s23  ;;  %s67_s25 = int_to_ptr.vmem [resolvable:$true] %s66_s25 }
  0x36   :  { %s991_s29 = scalar_lea.hbm %s1223_s2, 8192 }
  0x37   :  { %p992_p10 = scmp.ne.s32.totalorder %s1223_s2, %s991_s29  ;;  %p995_p11 = scmp.lt.u32.totalorder %s991_s29, %s1223_s2 }
  0x39   :  { %p997_p12 = pnand %p995_p11, %p992_p10 }
  0x3b   :  { %1000 = shalt.err (!%p997_p12)
}
  0x3c   :  { %s1001_s0 = scalar_lea.vmem %s45_s23, 8192  ;;  %p1006_p0 = scmp.lt.s32.totalorder %s45_s23, %s45_s23 }
  0x3d   :  { %p1002_p13 = scmp.ne.s32.totalorder %s45_s23, %s1001_s0  ;;  %p1007_p1 = scmp.lt.s32.totalorder %s1001_s0, %s1001_s0 }
  0x3f   :  { %p1008_p2 = por %p1007_p1, %p1006_p0 }
  0x41   :  { %p1009_p3 = pnand %p1008_p2, %p1002_p13 }
  0x43   :  { %1012 = shalt.err (!%p1009_p3)
}
  0x44   :  { %50 = dma.hbm_to_vmem [thread:$0]  %s1223_s2, 8192, %s45_s23, [#allocation8], %s1066_s15, %s1066_s15, %s1067_s16  }
  0x45   :  { %s1013_s13 = scalar_lea.hbm %s1225_s4, 2048 }
  0x46   :  { %p1014_p4 = scmp.ne.s32.totalorder %s1225_s4, %s1013_s13  ;;  %p1017_p5 = scmp.lt.u32.totalorder %s1013_s13, %s1225_s4 }
  0x48   :  { %p1019_p6 = pnand %p1017_p5, %p1014_p4 }
  0x4a   :  { %1022 = shalt.err (!%p1019_p6)
}
  0x4b   :  { %s1023_s3 = scalar_lea.vmem %s67_s25, 2048  ;;  %p1028_p8 = scmp.lt.s32.totalorder %s67_s25, %s67_s25 }
  0x4c   :  { %p1024_p7 = scmp.ne.s32.totalorder %s67_s25, %s1023_s3  ;;  %p1029_p9 = scmp.lt.s32.totalorder %s1023_s3, %s1023_s3 }
  0x4e   :  { %p1030_p10 = por %p1029_p9, %p1028_p8 }
  0x50   :  { %p1031_p11 = pnand %p1030_p10, %p1024_p7 }
  0x52   :  { %1034 = shalt.err (!%p1031_p11)
}
  0x53   :  { %s1072_s2 = smov 128   ;;  %s1073_s15 = smov 8  }
  0x54   :  { %72 = dma.hbm_to_vmem [thread:$0]  %s1225_s4, 2048, %s67_s25, [#allocation11], %s1072_s2, %s1072_s2, %s1073_s15  }
  0x55   :  { %1057 = dma.done.wait [#allocation5], 128  }
  0x56   :  { %1058 = vsyncadd [#allocation5], 4294967168 }
  0x57   :  { %1059 = dma.done.wait [#allocation8], 16384  }
  0x58   :  { %1060 = vsyncadd [#allocation8], 4294950912 }
  0x59   :  { %1061 = dma.done.wait [#allocation11], 2112  }
  0x5a   :  { %1062 = vsyncadd [#allocation11], 4294965184  ;;  %v1074_v0 = vmov 0.0   ;;  %v170_v1 = vld [vmem:[#allocation9 + $0x8] sm:$0xff]  ;;  %v172_v3 = vld [vmem:[#allocation9 + $0x18] sm:$0xff]  ;;  %vm1076_vm0 = vmmov 0  }
  0x5b   :  { %297 = vmatprep.mubr.f32.mxu0 %v1074_v0  ;;  %368 = vmatprep.mubr.f32.mxu1 %v1074_v0  ;;  %v174_v2 = vld [vmem:[#allocation9 + $0x28] sm:$0xff]  ;;  %v176_v5 = vld [vmem:[#allocation9 + $0x38] sm:$0xff]  ;;  %v169_v6 = vld [vmem:[#allocation9] sm:$0xff]  ;;  %s1077_s26 = smov [#allocation13]  }
  0x5c   :  { %v740_v4 = vpack.c.bf16 %v174_v2, %v170_v1  ;;  %v173_v7 = vld [vmem:[#allocation9 + $0x20] sm:$0xff]  ;;  %v772_v8 = vpack.c.bf16 %v176_v5, %v172_v3  ;;  %v171_v10 = vld [vmem:[#allocation9 + $0x10] sm:$0xff]  ;;  %v178_v12 = vld [vmem:[#allocation9 + $0x48] sm:$0xff] }
  0x5d   :  { %v742_v9 = vpack.c.bf16 %v173_v7, %v169_v6  ;;  %v175_v11 = vld [vmem:[#allocation9 + $0x30] sm:$0xff]  ;;  %v182_v14 = vld [vmem:[#allocation9 + $0x68] sm:$0xff]  ;;  %v180_v15 = vld [vmem:[#allocation9 + $0x58] sm:$0xff] }
  0x5e   :  { %741 = vmatprep.subr.bf16.mxu0 %v740_v4  ;;  %v774_v13 = vpack.c.bf16 %v175_v11, %v171_v10  ;;  %v184_v16 = vld [vmem:[#allocation9 + $0x78] sm:$0xff]  ;;  %773 = vmatprep.subr.bf16.mxu1 %v772_v8  ;;  %v744_v17 = vpack.c.bf16 %v182_v14, %v178_v12  ;;  %v177_v19 = vld [vmem:[#allocation9 + $0x40] sm:$0xff]  ;;  %v179_v21 = vld [vmem:[#allocation9 + $0x50] sm:$0xff] }
  0x5f   :  { %743 = vmatpush1.bf16.msra.mxu0 %v742_v9  ;;  %v776_v18 = vpack.c.bf16 %v184_v16, %v180_v15  ;;  %v181_v20 = vld [vmem:[#allocation9 + $0x60] sm:$0xff]  ;;  %v183_v23 = vld [vmem:[#allocation9 + $0x70] sm:$0xff]  ;;  %v186_v24 = vld [vmem:[#allocation9 + $0x88] sm:$0xff] }
  0x60   :  { %775 = vmatpush1.bf16.msra.mxu1 %v774_v13  ;;  %v746_v22 = vpack.c.bf16 %v181_v20, %v177_v19  ;;  %v190_v25 = vld [vmem:[#allocation9 + $0xa8] sm:$0xff]  ;;  %745 = vmatprep.subr.bf16.mxu0 %v744_v17  ;;  %v778_v26 = vpack.c.bf16 %v183_v23, %v179_v21  ;;  %v188_v28 = vld [vmem:[#allocation9 + $0x98] sm:$0xff]  ;;  %v185_v30 = vld [vmem:[#allocation9 + $0x80] sm:$0xff] }
  0x61   :  { %777 = vmatprep.subr.bf16.mxu1 %v776_v18  ;;  %v748_v27 = vpack.c.bf16 %v190_v25, %v186_v24  ;;  %v192_v29 = vld [vmem:[#allocation9 + $0xb8] sm:$0xff]  ;;  %v189_v32 = vld [vmem:[#allocation9 + $0xa0] sm:$0xff]  ;;  %v187_v33 = vld [vmem:[#allocation9 + $0x90] sm:$0xff] }
  0x62   :  { %v780_v31 = vpack.c.bf16 %v192_v29, %v188_v28  ;;  %v191_v34 = vld [vmem:[#allocation9 + $0xb0] sm:$0xff]  ;;  %v750_v35 = vpack.c.bf16 %v189_v32, %v185_v30  ;;  %v194_v36 = vld [vmem:[#allocation9 + $0xc8] sm:$0xff]  ;;  %v196_v38 = vld [vmem:[#allocation9 + $0xd8] sm:$0xff] }
  0x63   :  { %747 = vmatpush1.bf16.msra.mxu0 %v746_v22  ;;  %v198_v37 = vld [vmem:[#allocation9 + $0xe8] sm:$0xff]  ;;  %v782_v39 = vpack.c.bf16 %v191_v34, %v187_v33  ;;  %v200_v41 = vld [vmem:[#allocation9 + $0xf8] sm:$0xff]  ;;  %v193_v42 = vld [vmem:[#allocation9 + $0xc0] sm:$0xff] }
  0x64   :  { %779 = vmatpush1.bf16.msra.mxu1 %v778_v26  ;;  %749 = vmatprep.subr.bf16.mxu0 %v748_v27  ;;  %v752_v40 = vpack.c.bf16 %v198_v37, %v194_v36  ;;  %v197_v43 = vld [vmem:[#allocation9 + $0xe0] sm:$0xff]  ;;  %v784_v44 = vpack.c.bf16 %v200_v41, %v196_v38  ;;  %v195_v45 = vld [vmem:[#allocation9 + $0xd0] sm:$0xff]  ;;  %v202_v47 = vld [vmem:[#allocation9 + $0x108] sm:$0xff] }
  0x65   :  { %781 = vmatprep.subr.bf16.mxu1 %v780_v31  ;;  %v199_v46 = vld [vmem:[#allocation9 + $0xf0] sm:$0xff]  ;;  %v206_v48 = vld [vmem:[#allocation9 + $0x128] sm:$0xff]  ;;  %v204_v49 = vld [vmem:[#allocation9 + $0x118] sm:$0xff]  ;;  %v754_v51 = vpack.c.bf16 %v197_v43, %v193_v42 }
  0x66   :  { %v208_v50 = vld [vmem:[#allocation9 + $0x138] sm:$0xff]  ;;  %v786_v52 = vpack.c.bf16 %v199_v46, %v195_v45  ;;  %v756_v53 = vpack.c.bf16 %v206_v48, %v202_v47  ;;  %v201_v54 = vld [vmem:[#allocation9 + $0x100] sm:$0xff]  ;;  %v203_v56 = vld [vmem:[#allocation9 + $0x110] sm:$0xff] }
  0x67   :  { %751 = vmatpush1.bf16.msra.mxu0 %v750_v35  ;;  %v205_v55 = vld [vmem:[#allocation9 + $0x120] sm:$0xff]  ;;  %v788_v57 = vpack.c.bf16 %v208_v50, %v204_v49  ;;  %v207_v58 = vld [vmem:[#allocation9 + $0x130] sm:$0xff]  ;;  %v210_v59 = vld [vmem:[#allocation9 + $0x148] sm:$0xff] }
  0x68   :  { %783 = vmatpush1.bf16.msra.mxu1 %v782_v39  ;;  %753 = vmatprep.subr.bf16.mxu0 %v752_v40  ;;  %v214_v60 = vld [vmem:[#allocation9 + $0x168] sm:$0xff]  ;;  %v212_v61 = vld [vmem:[#allocation9 + $0x158] sm:$0xff]  ;;  %v758_v63 = vpack.c.bf16 %v205_v55, %v201_v54  ;;  %v790_v1 = vpack.c.bf16 %v207_v58, %v203_v56  ;;  %v209_v3 = vld [vmem:[#allocation9 + $0x140] sm:$0xff] }
  0x69   :  { %785 = vmatprep.subr.bf16.mxu1 %v784_v44  ;;  %v216_v62 = vld [vmem:[#allocation9 + $0x178] sm:$0xff]  ;;  %v760_v2 = vpack.c.bf16 %v214_v60, %v210_v59  ;;  %v213_v4 = vld [vmem:[#allocation9 + $0x160] sm:$0xff]  ;;  %v211_v5 = vld [vmem:[#allocation9 + $0x150] sm:$0xff] }
  0x6a   :  { %v792_v6 = vpack.c.bf16 %v216_v62, %v212_v61  ;;  %v215_v7 = vld [vmem:[#allocation9 + $0x170] sm:$0xff]  ;;  %v218_v8 = vld [vmem:[#allocation9 + $0x188] sm:$0xff]  ;;  %v220_v10 = vld [vmem:[#allocation9 + $0x198] sm:$0xff]  ;;  %v762_v12 = vpack.c.bf16 %v213_v4, %v209_v3 }
  0x6b   :  { %755 = vmatpush1.bf16.msra.mxu0 %v754_v51  ;;  %v222_v9 = vld [vmem:[#allocation9 + $0x1a8] sm:$0xff]  ;;  %v224_v11 = vld [vmem:[#allocation9 + $0x1b8] sm:$0xff]  ;;  %v794_v13 = vpack.c.bf16 %v215_v7, %v211_v5  ;;  %v217_v15 = vld [vmem:[#allocation9 + $0x180] sm:$0xff] }
  0x6c   :  { %787 = vmatpush1.bf16.msra.mxu1 %v786_v52  ;;  %757 = vmatprep.subr.bf16.mxu0 %v756_v53  ;;  %v764_v14 = vpack.c.bf16 %v222_v9, %v218_v8  ;;  %v221_v16 = vld [vmem:[#allocation9 + $0x1a0] sm:$0xff]  ;;  %v219_v17 = vld [vmem:[#allocation9 + $0x190] sm:$0xff]  ;;  %v796_v18 = vpack.c.bf16 %v224_v11, %v220_v10  ;;  %v226_v20 = vld [vmem:[#allocation9 + $0x1c8] sm:$0xff] }
  0x6d   :  { %789 = vmatprep.subr.bf16.mxu1 %v788_v57  ;;  %v223_v19 = vld [vmem:[#allocation9 + $0x1b0] sm:$0xff]  ;;  %v230_v21 = vld [vmem:[#allocation9 + $0x1e8] sm:$0xff]  ;;  %v228_v22 = vld [vmem:[#allocation9 + $0x1d8] sm:$0xff]  ;;  %v766_v24 = vpack.c.bf16 %v221_v16, %v217_v15 }
  0x6e   :  { %v232_v23 = vld [vmem:[#allocation9 + $0x1f8] sm:$0xff]  ;;  %v798_v25 = vpack.c.bf16 %v223_v19, %v219_v17  ;;  %v768_v26 = vpack.c.bf16 %v230_v21, %v226_v20  ;;  %v225_v27 = vld [vmem:[#allocation9 + $0x1c0] sm:$0xff]  ;;  %v227_v29 = vld [vmem:[#allocation9 + $0x1d0] sm:$0xff] }
  0x6f   :  { %759 = vmatpush1.bf16.msra.mxu0 %v758_v63  ;;  %v229_v28 = vld [vmem:[#allocation9 + $0x1e0] sm:$0xff]  ;;  %v800_v30 = vpack.c.bf16 %v232_v23, %v228_v22  ;;  %v231_v31 = vld [vmem:[#allocation9 + $0x1f0] sm:$0xff]  ;;  %v106_v32 = vld [vmem:[#allocation7 + $0x8] sm:$0xff] }
  0x70   :  { %791 = vmatpush1.bf16.msra.mxu1 %v790_v1  ;;  %761 = vmatprep.subr.bf16.mxu0 %v760_v2  ;;  %v110_v33 = vld [vmem:[#allocation7 + $0x28] sm:$0xff]  ;;  %v108_v34 = vld [vmem:[#allocation7 + $0x18] sm:$0xff]  ;;  %v770_v36 = vpack.c.bf16 %v229_v28, %v225_v27  ;;  %v802_v37 = vpack.c.bf16 %v231_v31, %v227_v29  ;;  %v105_v39 = vld [vmem:[#allocation7] sm:$0xff] }
  0x71   :  { %793 = vmatprep.subr.bf16.mxu1 %v792_v6  ;;  %v112_v35 = vld [vmem:[#allocation7 + $0x38] sm:$0xff]  ;;  %v804_v38 = vpack.c.bf16 %v110_v33, %v106_v32  ;;  %v109_v40 = vld [vmem:[#allocation7 + $0x20] sm:$0xff]  ;;  %v107_v41 = vld [vmem:[#allocation7 + $0x10] sm:$0xff] }
  0x72   :  { %v836_v42 = vpack.c.bf16 %v112_v35, %v108_v34  ;;  %v111_v43 = vld [vmem:[#allocation7 + $0x30] sm:$0xff]  ;;  %v114_v44 = vld [vmem:[#allocation7 + $0x48] sm:$0xff]  ;;  %v116_v46 = vld [vmem:[#allocation7 + $0x58] sm:$0xff]  ;;  %v806_v49 = vpack.c.bf16 %v109_v40, %v105_v39 }
  0x73   :  { %763 = vmatpush1.bf16.msra.mxu0 %v762_v12  ;;  %v118_v45 = vld [vmem:[#allocation7 + $0x68] sm:$0xff]  ;;  %v120_v47 = vld [vmem:[#allocation7 + $0x78] sm:$0xff]  ;;  %v838_v50 = vpack.c.bf16 %v111_v43, %v107_v41  ;;  %v113_v52 = vld [vmem:[#allocation7 + $0x40] sm:$0xff] }
  0x74   :  { %795 = vmatpush1.bf16.msra.mxu1 %v794_v13  ;;  %765 = vmatprep.subr.bf16.mxu0 %v764_v14  ;;  %v98_v48 = vld [vmem:[%s1227_s6] sm:$0xff]  ;;  %v808_v51 = vpack.c.bf16 %v118_v45, %v114_v44  ;;  %v117_v53 = vld [vmem:[#allocation7 + $0x60] sm:$0xff]  ;;  %v115_v54 = vld [vmem:[#allocation7 + $0x50] sm:$0xff]  ;;  %v840_v55 = vpack.c.bf16 %v120_v47, %v116_v46 }
  0x75   :  { %797 = vmatprep.subr.bf16.mxu1 %v796_v18  ;;  %v119_v56 = vld [vmem:[#allocation7 + $0x70] sm:$0xff]  ;;  %v122_v57 = vld [vmem:[#allocation7 + $0x88] sm:$0xff]  ;;  %v124_v59 = vld [vmem:[#allocation7 + $0x98] sm:$0xff]  ;;  %v810_v61 = vpack.c.bf16 %v117_v53, %v113_v52 }
  0x76   :  { %v126_v58 = vld [vmem:[#allocation7 + $0xa8] sm:$0xff]  ;;  %v128_v60 = vld [vmem:[#allocation7 + $0xb8] sm:$0xff]  ;;  %v842_v62 = vpack.c.bf16 %v119_v56, %v115_v54  ;;  %v121_v1 = vld [vmem:[#allocation7 + $0x80] sm:$0xff] }
  0x77   :  { %767 = vmatpush1.bf16.msra.mxu0 %v766_v24  ;;  %v812_v63 = vpack.c.bf16 %v126_v58, %v122_v57  ;;  %v125_v2 = vld [vmem:[#allocation7 + $0xa0] sm:$0xff]  ;;  %v123_v3 = vld [vmem:[#allocation7 + $0x90] sm:$0xff]  ;;  %v844_v4 = vpack.c.bf16 %v128_v60, %v124_v59  ;;  %v130_v6 = vld [vmem:[#allocation7 + $0xc8] sm:$0xff] }
  0x78   :  { %799 = vmatpush1.bf16.msra.mxu1 %v798_v25  ;;  %769 = vmatprep.subr.bf16.mxu0 %v768_v26  ;;  %v127_v5 = vld [vmem:[#allocation7 + $0xb0] sm:$0xff]  ;;  %v134_v7 = vld [vmem:[#allocation7 + $0xe8] sm:$0xff]  ;;  %v132_v8 = vld [vmem:[#allocation7 + $0xd8] sm:$0xff]  ;;  %v814_v10 = vpack.c.bf16 %v125_v2, %v121_v1 }
  0x79   :  { %801 = vmatprep.subr.bf16.mxu1 %v800_v30  ;;  %v136_v9 = vld [vmem:[#allocation7 + $0xf8] sm:$0xff]  ;;  %v846_v11 = vpack.c.bf16 %v127_v5, %v123_v3  ;;  %v816_v12 = vpack.c.bf16 %v134_v7, %v130_v6  ;;  %v129_v13 = vld [vmem:[#allocation7 + $0xc0] sm:$0xff]  ;;  %v131_v15 = vld [vmem:[#allocation7 + $0xd0] sm:$0xff] }
  0x7a   :  { %v133_v14 = vld [vmem:[#allocation7 + $0xe0] sm:$0xff]  ;;  %v848_v16 = vpack.c.bf16 %v136_v9, %v132_v8  ;;  %v135_v17 = vld [vmem:[#allocation7 + $0xf0] sm:$0xff]  ;;  %v138_v18 = vld [vmem:[#allocation7 + $0x108] sm:$0xff]  ;;  %v1075_v9 = vmov 0.0|0.0  }
  0x7b   :  { %771 = vmatpush1.bf16.msra.mxu0 %v770_v36  ;;  %v142_v19 = vld [vmem:[#allocation7 + $0x128] sm:$0xff]  ;;  %v140_v20 = vld [vmem:[#allocation7 + $0x118] sm:$0xff]  ;;  %v818_v22 = vpack.c.bf16 %v133_v14, %v129_v13  ;;  %v850_v23 = vpack.c.bf16 %v135_v17, %v131_v15  ;;  %v137_v25 = vld [vmem:[#allocation7 + $0x100] sm:$0xff] }
  0x7c   :  { %803 = vmatpush1.bf16.msra.mxu1 %v802_v37  ;;  %805 = vmatprep.subr.bf16.mxu0 %v804_v38  ;;  %v144_v21 = vld [vmem:[#allocation7 + $0x138] sm:$0xff]  ;;  %v820_v24 = vpack.c.bf16 %v142_v19, %v138_v18  ;;  %v141_v26 = vld [vmem:[#allocation7 + $0x120] sm:$0xff]  ;;  %v139_v27 = vld [vmem:[#allocation7 + $0x110] sm:$0xff] }
  0x7d   :  { %837 = vmatprep.subr.bf16.mxu1 %v836_v42  ;;  %v852_v28 = vpack.c.bf16 %v144_v21, %v140_v20  ;;  %v143_v29 = vld [vmem:[#allocation7 + $0x130] sm:$0xff]  ;;  %v146_v30 = vld [vmem:[#allocation7 + $0x148] sm:$0xff]  ;;  %v148_v32 = vld [vmem:[#allocation7 + $0x158] sm:$0xff]  ;;  %v822_v34 = vpack.c.bf16 %v141_v26, %v137_v25 }
  0x7e   :  { %298 = vmatmul.mubr.f32.vlgmr.msra.gmra.mrb[0].mxu0 %v98_v48  ;;  %v150_v31 = vld [vmem:[#allocation7 + $0x168] sm:$0xff]  ;;  %v152_v33 = vld [vmem:[#allocation7 + $0x178] sm:$0xff]  ;;  %v854_v35 = vpack.c.bf16 %v143_v29, %v139_v27  ;;  %v145_v37 = vld [vmem:[#allocation7 + $0x140] sm:$0xff] }
  0x7f   :  { %369 = vmatmul.mubr.f32.vlgmr.msra.gmra.mrb[0].mxu1 %v98_v48  ;;  %807 = vmatpush1.bf16.msra.mxu0 %v806_v49  ;;  %v824_v36 = vpack.c.bf16 %v150_v31, %v146_v30  ;;  %v149_v38 = vld [vmem:[#allocation7 + $0x160] sm:$0xff]  ;;  %v147_v39 = vld [vmem:[#allocation7 + $0x150] sm:$0xff]  ;;  %v856_v40 = vpack.c.bf16 %v152_v33, %v148_v32  ;;  %v154_v42 = vld [vmem:[#allocation7 + $0x188] sm:$0xff]  ;;  %v519_v31 = vlaneseq }
  0x80   :  { %839 = vmatpush1.bf16.msra.mxu1 %v838_v50  ;;  %809 = vmatprep.subr.bf16.mxu0 %v808_v51  ;;  %v151_v41 = vld [vmem:[#allocation7 + $0x170] sm:$0xff]  ;;  %v158_v43 = vld [vmem:[#allocation7 + $0x1a8] sm:$0xff]  ;;  %v156_v44 = vld [vmem:[#allocation7 + $0x198] sm:$0xff]  ;;  %v826_v46 = vpack.c.bf16 %v149_v38, %v145_v37 }
  0x81   :  { %841 = vmatprep.subr.bf16.mxu1 %v840_v55  ;;  %439 = vmatprep.mubr.f32.mxu0 %v1074_v0  ;;  %v160_v45 = vld [vmem:[#allocation7 + $0x1b8] sm:$0xff]  ;;  %v858_v47 = vpack.c.bf16 %v151_v41, %v147_v39  ;;  %v828_v48 = vpack.c.bf16 %v158_v43, %v154_v42  ;;  %v153_v49 = vld [vmem:[#allocation7 + $0x180] sm:$0xff]  ;;  %v155_v51 = vld [vmem:[#allocation7 + $0x190] sm:$0xff]  ;;  %v520_v32 = vshrl.u32 %v519_v31, 7 }
  0x82   :  { %510 = vmatprep.mubr.f32.mxu1 %v1074_v0  ;;  %v157_v50 = vld [vmem:[#allocation7 + $0x1a0] sm:$0xff]  ;;  %v860_v52 = vpack.c.bf16 %v160_v45, %v156_v44  ;;  %v159_v53 = vld [vmem:[#allocation7 + $0x1b0] sm:$0xff]  ;;  %v162_v54 = vld [vmem:[#allocation7 + $0x1c8] sm:$0xff] }
  0x83   :  { %811 = vmatpush1.bf16.msra.mxu0 %v810_v61  ;;  %v166_v55 = vld [vmem:[#allocation7 + $0x1e8] sm:$0xff]  ;;  %v164_v56 = vld [vmem:[#allocation7 + $0x1d8] sm:$0xff]  ;;  %v830_v58 = vpack.c.bf16 %v157_v50, %v153_v49  ;;  %v862_v59 = vpack.c.bf16 %v159_v53, %v155_v51  ;;  %v161_v61 = vld [vmem:[#allocation7 + $0x1c0] sm:$0xff]  ;;  %v521_v33 = vsub.s32 0, %v520_v32  ;;  %v533_v39 = vsub.s32 3, %v520_v32 }
  0x84   :  { %843 = vmatpush1.bf16.msra.mxu1 %v842_v62  ;;  %813 = vmatprep.subr.bf16.mxu0 %v812_v63  ;;  %v168_v57 = vld [vmem:[#allocation7 + $0x1f8] sm:$0xff]  ;;  %v832_v60 = vpack.c.bf16 %v166_v55, %v162_v54  ;;  %v165_v62 = vld [vmem:[#allocation7 + $0x1e0] sm:$0xff]  ;;  %v163_v1 = vld [vmem:[#allocation7 + $0x1d0] sm:$0xff] }
  0x85   :  { %845 = vmatprep.subr.bf16.mxu1 %v844_v4  ;;  %v864_v63 = vpack.c.bf16 %v168_v57, %v164_v56  ;;  %v167_v2 = vld [vmem:[#allocation7 + $0x1f0] sm:$0xff]  ;;  %v834_v3 = vpack.c.bf16 %v165_v62, %v161_v61  ;;  %v104_v5 = vld [vmem:[#allocation4] sm:$0xff]  ;;  %v569_v6 = vld [vmem:[#allocation12] sm:$0xff] }
  0x86   :  { %v866_v4 = vpack.c.bf16 %v167_v2, %v163_v1  ;;  %v570_v7 = vld [vmem:[#allocation12 + $0x8] sm:$0xff]  ;;  %v573_v13 = vld [vmem:[#allocation12 + $0x20] sm:$0xff]  ;;  %v576_v17 = vld [vmem:[#allocation12 + $0x38] sm:$0xff] }
  0x87   :  { %815 = vmatpush1.bf16.msra.mxu0 %v814_v10  ;;  %v869_v8 = vpack.c.bf16 %v570_v7, %v569_v6  ;;  %v571_v10 = vld [vmem:[#allocation12 + $0x10] sm:$0xff]  ;;  %v574_v14 = vld [vmem:[#allocation12 + $0x28] sm:$0xff]  ;;  %v577_v19 = vld [vmem:[#allocation12 + $0x40] sm:$0xff] }
  0x88   :  { %847 = vmatpush1.bf16.msra.mxu1 %v846_v11  ;;  %817 = vmatprep.subr.bf16.mxu0 %v816_v12  ;;  %v572_v11 = vld [vmem:[#allocation12 + $0x18] sm:$0xff]  ;;  %v875_v15 = vpack.c.bf16 %v574_v14, %v573_v13  ;;  %v578_v20 = vld [vmem:[#allocation12 + $0x48] sm:$0xff] }
  0x89   :  { %849 = vmatprep.subr.bf16.mxu1 %v848_v16  ;;  %v872_v12 = vpack.c.bf16 %v572_v11, %v571_v10  ;;  %v575_v16 = vld [vmem:[#allocation12 + $0x30] sm:$0xff]  ;;  %v881_v21 = vpack.c.bf16 %v578_v20, %v577_v19  ;;  %v582_v26 = vld [vmem:[#allocation12 + $0x68] sm:$0xff]  ;;  %v584_v29 = vld [vmem:[#allocation12 + $0x78] sm:$0xff] }
  0x8a   :  { %v878_v18 = vpack.c.bf16 %v576_v17, %v575_v16 }
  0x8b   :  { %819 = vmatpush1.bf16.msra.mxu0 %v818_v22  ;;  %v579_v22 = vld [vmem:[#allocation12 + $0x50] sm:$0xff] }
  0x8c   :  { %851 = vmatpush1.bf16.msra.mxu1 %v850_v23  ;;  %821 = vmatprep.subr.bf16.mxu0 %v820_v24  ;;  %v580_v23 = vld [vmem:[#allocation12 + $0x58] sm:$0xff]  ;;  %v581_v24 = vld [vmem:[#allocation12 + $0x60] sm:$0xff] }
  0x8d   :  { %853 = vmatprep.subr.bf16.mxu1 %v852_v28  ;;  %v884_v25 = vpack.c.bf16 %v580_v23, %v579_v22  ;;  %v887_v27 = vpack.c.bf16 %v582_v26, %v581_v24  ;;  %v583_v28 = vld [vmem:[#allocation12 + $0x70] sm:$0xff] }
  0x8e   :  { %v890_v30 = vpack.c.bf16 %v584_v29, %v583_v28 }
  0x8f   :  { %823 = vmatpush1.bf16.msra.mxu0 %v822_v34  ;;  %v517_v34 = vld [vmem:[#allocation10] sm:$0xf] }
  0x90   :  { %855 = vmatpush1.bf16.msra.mxu1 %v854_v35  ;;  %825 = vmatprep.subr.bf16.mxu0 %v824_v36  ;;  %v525_v35 = vsub.s32 1, %v520_v32  ;;  %v522_v36 = vrot.slane %v517_v34, %v521_v33 }
  0x91   :  { %857 = vmatprep.subr.bf16.mxu1 %v856_v40 }
  0x92   :  { %v526_v37 = vrot.slane %v517_v34, %v525_v35 }
  0x93   :  { %827 = vmatpush1.bf16.msra.mxu0 %v826_v46  ;;  %v534_v46 = vrot.slane %v517_v34, %v533_v39 }
  0x94   :  { %859 = vmatpush1.bf16.msra.mxu1 %v858_v47  ;;  %829 = vmatprep.subr.bf16.mxu0 %v828_v48  ;;  %v529_v47 = vsub.s32 2, %v520_v32 }
  0x95   :  { %861 = vmatprep.subr.bf16.mxu1 %v860_v52 }
  0x96   :  { %v530_v49 = vrot.slane %v517_v34, %v529_v47 }
  0x97   :  { %831 = vmatpush1.bf16.msra.mxu0 %v830_v58  ;;  %v100_v58 = vld [vmem:[%s1228_s7] sm:$0xff]  ;;  %s670_s7 = sshll.u32 %s1077_s26, 4  ;;  %s671_s7 = int_to_ptr.vmem [resolvable:$true] %s670_s7 }
  0x98   :  { %863 = vmatpush1.bf16.msra.mxu1 %v862_v59  ;;  %833 = vmatprep.subr.bf16.mxu0 %v832_v60  ;;  %s1035_s27 = scalar_lea.vmem %s671_s7, 256  ;;  %p1040_p13 = scmp.lt.s32.totalorder %s671_s7, %s671_s7 }
  0x99   :  { %865 = vmatprep.subr.bf16.mxu1 %v864_v63  ;;  %p1036_p12 = scmp.ne.s32.totalorder %s671_s7, %s1035_s27  ;;  %p1041_p0 = scmp.lt.s32.totalorder %s1035_s27, %s1035_s27 }
  0x9b   :  { %835 = vmatpush1.bf16.msra.mxu0 %v834_v3  ;;  %p1042_p1 = por %p1041_p0, %p1040_p13 }
  0x9c   :  { %867 = vmatpush1.bf16.msra.mxu1 %v866_v4  ;;  %868 = vmatprep.subr.bf16.mxu0 %v1075_v9 }
  0x9d   :  { %p1043_p2 = pnand %p1042_p1, %p1036_p12 }
  0x9e   :  { %440 = vmatmul.mubr.f32.vlgmr.msra.gmra.mrb[0].mxu0 %v104_v5 }
  0x9f   :  { %511 = vmatmul.mubr.f32.vlgmr.msra.gmra.mrb[0].mxu1 %v104_v5  ;;  %870 = vmatpush3.bf16.msra.mxu0 %v869_v8  ;;  %v687_v5 = vld [vmem:[%s1226_s5] ss:$0 sm:$0xff] }
  0xa0   :  { %871 = vmatprep.subr.bf16.mxu0 %v1075_v9  ;;  %737 = vmatprep.mubr.msk.f32.mxu0 %vm1076_vm0, %v1074_v0 }
  0xa3   :  { %873 = vmatpush3.bf16.msra.mxu0 %v872_v12 }
  0xa4   :  { %874 = vmatprep.subr.bf16.mxu0 %v1075_v9 }
  0xa7   :  { %876 = vmatpush3.bf16.msra.mxu0 %v875_v15 }
  0xa8   :  { %877 = vmatprep.subr.bf16.mxu0 %v1075_v9 }
  0xab   :  { %879 = vmatpush3.bf16.msra.mxu0 %v878_v18 }
  0xac   :  { %880 = vmatprep.subr.bf16.mxu0 %v1075_v9 }
  0xaf   :  { %882 = vmatpush3.bf16.msra.mxu0 %v881_v21 }
  0xb0   :  { %883 = vmatprep.subr.bf16.mxu0 %v1075_v9 }
  0xb3   :  { %885 = vmatpush3.bf16.msra.mxu0 %v884_v25 }
  0xb4   :  { %886 = vmatprep.subr.bf16.mxu0 %v1075_v9 }
  0xb7   :  { %888 = vmatpush3.bf16.msra.mxu0 %v887_v27 }
  0xb8   :  { %889 = vmatprep.subr.bf16.mxu0 %v1075_v9 }
  0xbb   :  { %891 = vmatpush3.bf16.msra.mxu0 %v890_v30 }
 0x171   :  { %v441_v38 = vpop.f32.mrb[0].mxu0 }
 0x172   :  { %v539_v40 = vadd.f32 %v522_v36, %v441_v38  ;;  %v512_v0 = vpop.f32.mrb[0].mxu1  ;;  %v443_v41 = vpop.f32.mrb[1].mxu0 }
 0x173   :  { %v540_v42 = vadd.f32 %v526_v37, %v443_v41  ;;  %v514_v43 = vpop.f32.mrb[1].mxu1  ;;  %v541_v51 = vadd.f32 %v530_v49, %v512_v0 }
 0x174   :  { %v684_v44 = vmul.f32 -1.442695, %v539_v40  ;;  %v542_v48 = vadd.f32 %v534_v46, %v514_v43 }
 0x175   :  { %v685_v45 = vmul.f32 -1.442695, %v540_v42 }
 0x176   :  { %909 = vpow2.f32 %v684_v44  ;;  %v686_v50 = vmul.f32 -1.442695, %v542_v48 }
 0x177   :  { %911 = vpow2.f32 %v685_v45 }
 0x178   :  { %913 = vpow2.f32 %v686_v50 }
 0x179   :  { %915 = vtanh.f32 %v541_v51 }
 0x180   :  { %v910_v52 = vpop.eup %909 }
 0x181   :  { %v912_v53 = vpop.eup %911  ;;  %v546_v54 = vadd.f32 1.0, %v910_v52 }
 0x182   :  { %v552_v55 = vadd.f32 1.0, %v912_v53  ;;  %v914_v56 = vpop.eup %913 }
 0x183   :  { %917 = vrcp.f32 %v546_v54  ;;  %v916_v57 = vpop.eup %915  ;;  %v559_v62 = vadd.f32 1.0, %v914_v56 }
 0x184   :  { %919 = vrcp.f32 %v552_v55 }
 0x185   :  { %921 = vrcp.f32 %v559_v62 }
 0x18d   :  { %v918_v59 = vpop.eup %917 }
 0x18e   :  { %v920_v60 = vpop.eup %919  ;;  %v563_v61 = vmul.f32 %v918_v59, %v916_v57 }
 0x18f   :  { %v562_v63 = vmul.f32 %v920_v60, %v100_v58  ;;  %v922_v2 = vpop.eup %921 }
 0x191   :  { %v564_v1 = vadd.f32 %v563_v61, %v562_v63 }
 0x193   :  { %664 = vst [vmem:[#allocation13 + $0x8] sm:$0xff] %v564_v1  ;;  %923 = vtanh.f32 %v564_v1 }
 0x19d   :  { %v924_v3 = vpop.eup %923 }
 0x19e   :  { %v566_v4 = vmul.f32 %v924_v3, %v922_v2 }
 0x1a0   :  { %738 = vmatmul.mubr.f32.vlgmr.msra.gmra.mrb[2].mxu0 %v566_v4 }
 0x273   :  { %v658_v6 = vpop.f32.mrb[2].mxu0 }
 0x274   :  { %v659_v7 = vadd.f32 %v687_v5, %v658_v6  ;;  %v739_v8 = vpop.f32.mrb[3].mxu0 }
 0x276   :  { %v662_v9 = vadd.f32 %v659_v7, %v566_v4 }
 0x278   :  { %663 = vst [vmem:[#allocation13] sm:$0xff] %v662_v9 }
 0x279   :  { %1046 = shalt.err (!%p1043_p2)
}
 0x27a   :  { %s1047_s1 = scalar_lea.hbm %s1229_s8, 256 }
 0x27b   :  { %p1048_p3 = scmp.ne.s32.totalorder %s1229_s8, %s1047_s1  ;;  %p1051_p4 = scmp.lt.u32.totalorder %s1047_s1, %s1229_s8 }
 0x27d   :  { %p1053_p5 = pnand %p1051_p4, %p1048_p3 }
 0x27f   :  { %1056 = shalt.err (!%p1053_p5)
}
 0x280   :  { %676 = dma.vmem_to_hbm [thread:$0]  %s671_s7, 256, %s1229_s8, [#allocation6], %s1072_s2, %s1072_s2, %s1073_s15  }
 0x281   :  { %1063 = dma.done.wait [#allocation6], 256  }
 0x282   :  { %1064 = vsyncadd [#allocation6], 4294967040 }
 0x283   :  { %680 = vsyncpa [#allocation5], 1 }
 0x284   :  { %681 = vsyncpa [#allocation8], 1 }
 0x285   :  { %682 = vsyncpa [#allocation11], 1 }
 0x286   :  { %683 = vsyncpa [#allocation6], 1 }

</bundles_post_ra>
